<compile_context>
chip_gen: v5e
topology: v5e:2x2
jax: 0.10.0
libtpu: 0.0.40
codegen_flags: <defaults>
</compile_context>

<pallas_src>
import jax
import jax.numpy as jnp
from jax.experimental import pallas as pl
from jax.experimental.pallas import tpu as pltpu

# TODO(synk): TorchScript-only helpers (get_methods / get_attributes) and the
# `forward_params` registered buffer are metadata, not compute; not translated.

LANE = 128
SUBLANE = 8


def _round_up(x, m):
    return ((x + m - 1) // m) * m


def _cdiv(a, b):
    return (a + b - 1) // b


def _sigmoid(x):
    # sigmoid(x) == (1 + tanh(x/2)) / 2 exactly; tanh runs on the EUP, the
    # remaining mul/add are cheap VALU ops — no f32 divide (perf review).
    return 0.5 * (jnp.tanh(0.5 * x) + 1.0)


# ----------------------------------------------------------------------------
# Kernel: one batch tile, full 7-layer forward pass with resident weights.
# ----------------------------------------------------------------------------
def mlp_kernel(x_ref, w_ref, b_ref, o_ref):
    n_layers = w_ref.shape[0]          # static (7)
    out_size = o_ref.shape[-1]         # static
    h = x_ref[...]                     # (TB, in_pad) f32
    for layer in range(n_layers):      # unrolled at trace time
        w = w_ref[layer]               # (D, D) bf16, static index into resident pack
        k = h.shape[-1]
        if k < w.shape[0]:             # first layer: narrow-K matmul (no x padding)
            w = w[:k, :]
        b = b_ref[layer]               # (1, D) f32
        y = jnp.dot(h.astype(w.dtype), w,
                    preferred_element_type=jnp.float32) + b
        h = _sigmoid(y) if layer < n_layers - 1 else y
    # Narrow store: only the useful output lanes hit HBM.
    o_ref[...] = h[:, :out_size].astype(o_ref.dtype)


# ----------------------------------------------------------------------------
# Parameter packing (done once at model load) and the jitted forward factory.
# ----------------------------------------------------------------------------
def pack_params(params, d_pad, w_dtype=jnp.bfloat16):
    """Pack list of (W [in,out], b [1,out]) into (L,D,D) bf16 and (L,1,D) f32."""
    n_layers = len(params)
    w_packed = jnp.zeros((n_layers, d_pad, d_pad), w_dtype)
    b_packed = jnp.zeros((n_layers, 1, d_pad), jnp.float32)
    for i, (w, b) in enumerate(params):
        fan_in, fan_out = w.shape
        w_packed = w_packed.at[i, :fan_in, :fan_out].set(w.astype(w_dtype))
        b_packed = b_packed.at[i, 0, :fan_out].set(b.reshape(-1).astype(jnp.float32))
    return w_packed, b_packed


def make_mlp_forward(params, *, block_batch=512):
    """Pack/pad parameters once; return a jitted forward(x).

    block_batch: batch-tile cap.  Sweep 512-1024 for large batches; per-step
    overhead (~0.35 us) dominates below ~512 rows per tile.
    """
    n_layers = len(params)
    layer_dims = [(w.shape[0], w.shape[1]) for w, _ in params]
    in_features = layer_dims[0][0]
    out_size = layer_dims[-1][1]

    # Common padded feature width (lane-aligned, covers every layer dim).
    all_dims = [in_features] + [fo for _, fo in layer_dims]
    d_pad = _round_up(max(max(all_dims), LANE), LANE)
    in_pad = _round_up(in_features, SUBLANE)   # x keeps its narrow width

    # Hoisted out of the per-call path: pack once; jit closes over these.
    w_packed, b_packed = pack_params(params, d_pad)

    def forward(x):
        batch = x.shape[0]
        batch_r = _round_up(batch, SUBLANE)
        tb = min(block_batch, batch_r)
        # >= 2 grid steps whenever batch allows, so ("parallel",) can shard the
        # batch across both TensorCores on v7x.
        if batch_r > SUBLANE:
            tb = min(tb, _round_up(_cdiv(batch_r, 2), SUBLANE))
        b_pad = _round_up(batch, tb)
        grid = (b_pad // tb,)

        # Batch-only padding; feature width stays narrow (in_pad, not 128).
        x_f = x.astype(jnp.float32)
        if x_f.shape != (b_pad, in_pad):
            x_f = jnp.zeros((b_pad, in_pad), jnp.float32).at[
                :batch, :in_features].set(x_f)

        cost = pl.CostEstimate(
            flops=2 * b_pad * sum(fi * fo for fi, fo in layer_dims),
            transcendentals=b_pad * sum(fo for _, fo in layer_dims[:-1]),
            bytes_accessed=(x_f.size * 4 + w_packed.size * 2
                            + b_packed.size * 4 + b_pad * out_size * 4),
        )

        out = pl.pallas_call(
            mlp_kernel,
            out_shape=jax.ShapeDtypeStruct((b_pad, out_size), jnp.float32),
            grid=grid,
            in_specs=[
                pl.BlockSpec((tb, in_pad), lambda i: (i, 0)),                  # x tile
                pl.BlockSpec((n_layers, d_pad, d_pad), lambda i: (0, 0, 0)),   # weights (resident)
                pl.BlockSpec((n_layers, 1, d_pad), lambda i: (0, 0, 0)),       # biases  (resident)
            ],
            out_specs=pl.BlockSpec((tb, out_size), lambda i: (i, 0)),
            compiler_params=pltpu.CompilerParams(
                dimension_semantics=("parallel",),   # v7x: shard batch across 2 TCs
            ),
            cost_estimate=cost,
        )(x_f, w_packed, b_packed)

        return out[:batch] if b_pad != batch else out

    return jax.jit(forward)


# ----------------------------------------------------------------------------
# Parameter init (mirrors MLPRegressor.__init__ layer shapes) and reference.
# ----------------------------------------------------------------------------
def init_params(key, input_size, hidden_size, output_size):
    dims = [
        (input_size, hidden_size // 2),        # fc1
        (hidden_size // 2, hidden_size),       # fc2
        (hidden_size, hidden_size),            # fc2b
        (hidden_size, hidden_size // 2),       # fc3
        (hidden_size // 2, hidden_size // 4),  # fc4
        (hidden_size // 4, hidden_size // 8),  # fc4b
        (hidden_size // 8, output_size),       # fc5
    ]
    params = []
    for fan_in, fan_out in dims:
        key, kw, kb = jax.random.split(key, 3)
        bound = 1.0 / jnp.sqrt(fan_in)
        # Stored as [in, out] (transpose of PyTorch's [out, in]) so y = x @ W + b.
        w = jax.random.uniform(kw, (fan_in, fan_out), jnp.float32, -bound, bound)
        b = jax.random.uniform(kb, (1, fan_out), jnp.float32, -bound, bound)
        params.append((w, b))
    return params


def reference_forward(x, params):
    """Plain-JAX reference using the same bf16-matmul / f32-accumulate /
    tanh-sigmoid math path as the kernel."""
    h = x.astype(jnp.float32)
    n = len(params)
    for i, (w, b) in enumerate(params):
        y = jnp.dot(h.astype(jnp.bfloat16), w.astype(jnp.bfloat16),
                    preferred_element_type=jnp.float32) + b
        h = _sigmoid(y) if i < n - 1 else y
    return h


if __name__ == "__main__":
    input_size, hidden_size, output_size = 8, 32, 4
    batch = 16   # > 8 so the 2-grid-step (megacore-shardable) path is exercised

    key = jax.random.PRNGKey(0)
    key, kx = jax.random.split(key)
    x = jax.random.normal(kx, (batch, input_size), dtype=jnp.float32)
    params = init_params(key, input_size, hidden_size, output_size)

    forward = make_mlp_forward(params)
    out = jax.block_until_ready(forward(x))

    ref = reference_forward(x, params)
    assert out.shape == (batch, output_size)
    # Kernel and reference share identical bf16-matmul / tanh-sigmoid math;
    # tolerance leaves headroom for sub-ulp EUP rounding differences between
    # the Mosaic and XLA lowerings that can flip a bf16 activation at a
    # rounding boundary.  Real wiring/padding bugs produce errors >> 1e-2.
    assert jnp.allclose(out, ref, atol=2e-3, rtol=2e-3), "mismatch vs reference"

    print("KERNEL_OK")
</pallas_src>

<mosaic_0001>
module attributes {stable_mosaic.version = 11 : i64} {
  func.func @mlp_kernel(%arg0: i32, %arg1: memref<8x8xf32, #tpu.memory_space<vmem>>, %arg2: memref<7x128x128xbf16, #tpu.memory_space<vmem>>, %arg3: memref<7x1x128xf32, #tpu.memory_space<vmem>>, %arg4: memref<8x4xf32, #tpu.memory_space<vmem>>) attributes {dimension_semantics = [#tpu.dimension_semantics<parallel>], iteration_bounds = array<i64: 2>, scalar_prefetch = 0 : i64, scratch_operands = 0 : i64, tpu.core_type = #tpu.core_type<tc>, window_params = [{transform_indices = @transform_0, window_bounds = array<i64: 8, 8>}, {pipeline_mode = #tpu.pipeline_mode<synchronous>, transform_indices = @transform_1, window_bounds = array<i64: 7, 128, 128>}, {pipeline_mode = #tpu.pipeline_mode<synchronous>, transform_indices = @transform_2, window_bounds = array<i64: 7, 1, 128>}, {transform_indices = @transform_3, window_bounds = array<i64: 8, 4>}]} {
    %c0 = arith.constant 0 : index
    %c0_0 = arith.constant 0 : index
    %0 = vector.load %arg1[%c0, %c0_0] : memref<8x8xf32, #tpu.memory_space<vmem>>, vector<8x8xf32>
    %c0_1 = arith.constant 0 : index
    %c0_2 = arith.constant 0 : index
    %c0_3 = arith.constant 0 : index
    %1 = vector.load %arg2[%c0_1, %c0_2, %c0_3] : memref<7x128x128xbf16, #tpu.memory_space<vmem>>, vector<1x128x128xbf16>
    %2 = vector.shape_cast %1 : vector<1x128x128xbf16> to vector<128x128xbf16>
    %3 = vector.extract_strided_slice %2 {offsets = [0, 0], sizes = [8, 128], strides = [1, 1]} : vector<128x128xbf16> to vector<8x128xbf16>
    %c0_4 = arith.constant 0 : index
    %c0_5 = arith.constant 0 : index
    %c0_6 = arith.constant 0 : index
    %4 = vector.load %arg3[%c0_4, %c0_5, %c0_6] : memref<7x1x128xf32, #tpu.memory_space<vmem>>, vector<1x1x128xf32>
    %5 = vector.shape_cast %4 : vector<1x1x128xf32> to vector<1x128xf32>
    %6 = arith.truncf %0 : vector<8x8xf32> to vector<8x8xbf16>
    %cst = arith.constant dense<0.000000e+00> : vector<8x128xf32>
    %7 = tpu.matmul %6, %3, %cst {dimension_numbers = #tpu.dot_dimension_numbers<[1], [0], [0], [1], [0, 0, 1, 1], [], []>} : vector<8x8xbf16>, vector<8x128xbf16>, vector<8x128xf32> -> vector<8x128xf32>
    %8 = vector.broadcast %5 : vector<1x128xf32> to vector<8x128xf32>
    %9 = arith.addf %7, %8 : vector<8x128xf32>
    %cst_7 = arith.constant 5.000000e-01 : f32
    %10 = vector.broadcast %cst_7 : f32 to vector<8x128xf32>
    %11 = arith.mulf %10, %9 : vector<8x128xf32>
    %12 = math.tanh %11 : vector<8x128xf32>
    %cst_8 = arith.constant 1.000000e+00 : f32
    %13 = vector.broadcast %cst_8 : f32 to vector<8x128xf32>
    %14 = arith.addf %12, %13 : vector<8x128xf32>
    %cst_9 = arith.constant 5.000000e-01 : f32
    %15 = vector.broadcast %cst_9 : f32 to vector<8x128xf32>
    %16 = arith.mulf %15, %14 : vector<8x128xf32>
    %c1 = arith.constant 1 : index
    %c0_10 = arith.constant 0 : index
    %c0_11 = arith.constant 0 : index
    %17 = vector.load %arg2[%c1, %c0_10, %c0_11] : memref<7x128x128xbf16, #tpu.memory_space<vmem>>, vector<1x128x128xbf16>
    %18 = vector.shape_cast %17 : vector<1x128x128xbf16> to vector<128x128xbf16>
    %c1_12 = arith.constant 1 : index
    %c0_13 = arith.constant 0 : index
    %c0_14 = arith.constant 0 : index
    %19 = vector.load %arg3[%c1_12, %c0_13, %c0_14] : memref<7x1x128xf32, #tpu.memory_space<vmem>>, vector<1x1x128xf32>
    %20 = vector.shape_cast %19 : vector<1x1x128xf32> to vector<1x128xf32>
    %21 = arith.truncf %16 : vector<8x128xf32> to vector<8x128xbf16>
    %cst_15 = arith.constant dense<0.000000e+00> : vector<8x128xf32>
    %22 = tpu.matmul %21, %18, %cst_15 {dimension_numbers = #tpu.dot_dimension_numbers<[1], [0], [0], [1], [0, 0, 1, 1], [], []>} : vector<8x128xbf16>, vector<128x128xbf16>, vector<8x128xf32> -> vector<8x128xf32>
    %23 = vector.broadcast %20 : vector<1x128xf32> to vector<8x128xf32>
    %24 = arith.addf %22, %23 : vector<8x128xf32>
    %cst_16 = arith.constant 5.000000e-01 : f32
    %25 = vector.broadcast %cst_16 : f32 to vector<8x128xf32>
    %26 = arith.mulf %25, %24 : vector<8x128xf32>
    %27 = math.tanh %26 : vector<8x128xf32>
    %cst_17 = arith.constant 1.000000e+00 : f32
    %28 = vector.broadcast %cst_17 : f32 to vector<8x128xf32>
    %29 = arith.addf %27, %28 : vector<8x128xf32>
    %cst_18 = arith.constant 5.000000e-01 : f32
    %30 = vector.broadcast %cst_18 : f32 to vector<8x128xf32>
    %31 = arith.mulf %30, %29 : vector<8x128xf32>
    %c2 = arith.constant 2 : index
    %c0_19 = arith.constant 0 : index
    %c0_20 = arith.constant 0 : index
    %32 = vector.load %arg2[%c2, %c0_19, %c0_20] : memref<7x128x128xbf16, #tpu.memory_space<vmem>>, vector<1x128x128xbf16>
    %33 = vector.shape_cast %32 : vector<1x128x128xbf16> to vector<128x128xbf16>
    %c2_21 = arith.constant 2 : index
    %c0_22 = arith.constant 0 : index
    %c0_23 = arith.constant 0 : index
    %34 = vector.load %arg3[%c2_21, %c0_22, %c0_23] : memref<7x1x128xf32, #tpu.memory_space<vmem>>, vector<1x1x128xf32>
    %35 = vector.shape_cast %34 : vector<1x1x128xf32> to vector<1x128xf32>
    %36 = arith.truncf %31 : vector<8x128xf32> to vector<8x128xbf16>
    %cst_24 = arith.constant dense<0.000000e+00> : vector<8x128xf32>
    %37 = tpu.matmul %36, %33, %cst_24 {dimension_numbers = #tpu.dot_dimension_numbers<[1], [0], [0], [1], [0, 0, 1, 1], [], []>} : vector<8x128xbf16>, vector<128x128xbf16>, vector<8x128xf32> -> vector<8x128xf32>
    %38 = vector.broadcast %35 : vector<1x128xf32> to vector<8x128xf32>
    %39 = arith.addf %37, %38 : vector<8x128xf32>
    %cst_25 = arith.constant 5.000000e-01 : f32
    %40 = vector.broadcast %cst_25 : f32 to vector<8x128xf32>
    %41 = arith.mulf %40, %39 : vector<8x128xf32>
    %42 = math.tanh %41 : vector<8x128xf32>
    %cst_26 = arith.constant 1.000000e+00 : f32
    %43 = vector.broadcast %cst_26 : f32 to vector<8x128xf32>
    %44 = arith.addf %42, %43 : vector<8x128xf32>
    %cst_27 = arith.constant 5.000000e-01 : f32
    %45 = vector.broadcast %cst_27 : f32 to vector<8x128xf32>
    %46 = arith.mulf %45, %44 : vector<8x128xf32>
    %c3 = arith.constant 3 : index
    %c0_28 = arith.constant 0 : index
    %c0_29 = arith.constant 0 : index
    %47 = vector.load %arg2[%c3, %c0_28, %c0_29] : memref<7x128x128xbf16, #tpu.memory_space<vmem>>, vector<1x128x128xbf16>
    %48 = vector.shape_cast %47 : vector<1x128x128xbf16> to vector<128x128xbf16>
    %c3_30 = arith.constant 3 : index
    %c0_31 = arith.constant 0 : index
    %c0_32 = arith.constant 0 : index
    %49 = vector.load %arg3[%c3_30, %c0_31, %c0_32] : memref<7x1x128xf32, #tpu.memory_space<vmem>>, vector<1x1x128xf32>
    %50 = vector.shape_cast %49 : vector<1x1x128xf32> to vector<1x128xf32>
    %51 = arith.truncf %46 : vector<8x128xf32> to vector<8x128xbf16>
    %cst_33 = arith.constant dense<0.000000e+00> : vector<8x128xf32>
    %52 = tpu.matmul %51, %48, %cst_33 {dimension_numbers = #tpu.dot_dimension_numbers<[1], [0], [0], [1], [0, 0, 1, 1], [], []>} : vector<8x128xbf16>, vector<128x128xbf16>, vector<8x128xf32> -> vector<8x128xf32>
    %53 = vector.broadcast %50 : vector<1x128xf32> to vector<8x128xf32>
    %54 = arith.addf %52, %53 : vector<8x128xf32>
    %cst_34 = arith.constant 5.000000e-01 : f32
    %55 = vector.broadcast %cst_34 : f32 to vector<8x128xf32>
    %56 = arith.mulf %55, %54 : vector<8x128xf32>
    %57 = math.tanh %56 : vector<8x128xf32>
    %cst_35 = arith.constant 1.000000e+00 : f32
    %58 = vector.broadcast %cst_35 : f32 to vector<8x128xf32>
    %59 = arith.addf %57, %58 : vector<8x128xf32>
    %cst_36 = arith.constant 5.000000e-01 : f32
    %60 = vector.broadcast %cst_36 : f32 to vector<8x128xf32>
    %61 = arith.mulf %60, %59 : vector<8x128xf32>
    %c4 = arith.constant 4 : index
    %c0_37 = arith.constant 0 : index
    %c0_38 = arith.constant 0 : index
    %62 = vector.load %arg2[%c4, %c0_37, %c0_38] : memref<7x128x128xbf16, #tpu.memory_space<vmem>>, vector<1x128x128xbf16>
    %63 = vector.shape_cast %62 : vector<1x128x128xbf16> to vector<128x128xbf16>
    %c4_39 = arith.constant 4 : index
    %c0_40 = arith.constant 0 : index
    %c0_41 = arith.constant 0 : index
    %64 = vector.load %arg3[%c4_39, %c0_40, %c0_41] : memref<7x1x128xf32, #tpu.memory_space<vmem>>, vector<1x1x128xf32>
    %65 = vector.shape_cast %64 : vector<1x1x128xf32> to vector<1x128xf32>
    %66 = arith.truncf %61 : vector<8x128xf32> to vector<8x128xbf16>
    %cst_42 = arith.constant dense<0.000000e+00> : vector<8x128xf32>
    %67 = tpu.matmul %66, %63, %cst_42 {dimension_numbers = #tpu.dot_dimension_numbers<[1], [0], [0], [1], [0, 0, 1, 1], [], []>} : vector<8x128xbf16>, vector<128x128xbf16>, vector<8x128xf32> -> vector<8x128xf32>
    %68 = vector.broadcast %65 : vector<1x128xf32> to vector<8x128xf32>
    %69 = arith.addf %67, %68 : vector<8x128xf32>
    %cst_43 = arith.constant 5.000000e-01 : f32
    %70 = vector.broadcast %cst_43 : f32 to vector<8x128xf32>
    %71 = arith.mulf %70, %69 : vector<8x128xf32>
    %72 = math.tanh %71 : vector<8x128xf32>
    %cst_44 = arith.constant 1.000000e+00 : f32
    %73 = vector.broadcast %cst_44 : f32 to vector<8x128xf32>
    %74 = arith.addf %72, %73 : vector<8x128xf32>
    %cst_45 = arith.constant 5.000000e-01 : f32
    %75 = vector.broadcast %cst_45 : f32 to vector<8x128xf32>
    %76 = arith.mulf %75, %74 : vector<8x128xf32>
    %c5 = arith.constant 5 : index
    %c0_46 = arith.constant 0 : index
    %c0_47 = arith.constant 0 : index
    %77 = vector.load %arg2[%c5, %c0_46, %c0_47] : memref<7x128x128xbf16, #tpu.memory_space<vmem>>, vector<1x128x128xbf16>
    %78 = vector.shape_cast %77 : vector<1x128x128xbf16> to vector<128x128xbf16>
    %c5_48 = arith.constant 5 : index
    %c0_49 = arith.constant 0 : index
    %c0_50 = arith.constant 0 : index
    %79 = vector.load %arg3[%c5_48, %c0_49, %c0_50] : memref<7x1x128xf32, #tpu.memory_space<vmem>>, vector<1x1x128xf32>
    %80 = vector.shape_cast %79 : vector<1x1x128xf32> to vector<1x128xf32>
    %81 = arith.truncf %76 : vector<8x128xf32> to vector<8x128xbf16>
    %cst_51 = arith.constant dense<0.000000e+00> : vector<8x128xf32>
    %82 = tpu.matmul %81, %78, %cst_51 {dimension_numbers = #tpu.dot_dimension_numbers<[1], [0], [0], [1], [0, 0, 1, 1], [], []>} : vector<8x128xbf16>, vector<128x128xbf16>, vector<8x128xf32> -> vector<8x128xf32>
    %83 = vector.broadcast %80 : vector<1x128xf32> to vector<8x128xf32>
    %84 = arith.addf %82, %83 : vector<8x128xf32>
    %cst_52 = arith.constant 5.000000e-01 : f32
    %85 = vector.broadcast %cst_52 : f32 to vector<8x128xf32>
    %86 = arith.mulf %85, %84 : vector<8x128xf32>
    %87 = math.tanh %86 : vector<8x128xf32>
    %cst_53 = arith.constant 1.000000e+00 : f32
    %88 = vector.broadcast %cst_53 : f32 to vector<8x128xf32>
    %89 = arith.addf %87, %88 : vector<8x128xf32>
    %cst_54 = arith.constant 5.000000e-01 : f32
    %90 = vector.broadcast %cst_54 : f32 to vector<8x128xf32>
    %91 = arith.mulf %90, %89 : vector<8x128xf32>
    %c6 = arith.constant 6 : index
    %c0_55 = arith.constant 0 : index
    %c0_56 = arith.constant 0 : index
    %92 = vector.load %arg2[%c6, %c0_55, %c0_56] : memref<7x128x128xbf16, #tpu.memory_space<vmem>>, vector<1x128x128xbf16>
    %93 = vector.shape_cast %92 : vector<1x128x128xbf16> to vector<128x128xbf16>
    %c6_57 = arith.constant 6 : index
    %c0_58 = arith.constant 0 : index
    %c0_59 = arith.constant 0 : index
    %94 = vector.load %arg3[%c6_57, %c0_58, %c0_59] : memref<7x1x128xf32, #tpu.memory_space<vmem>>, vector<1x1x128xf32>
    %95 = vector.shape_cast %94 : vector<1x1x128xf32> to vector<1x128xf32>
    %96 = arith.truncf %91 : vector<8x128xf32> to vector<8x128xbf16>
    %cst_60 = arith.constant dense<0.000000e+00> : vector<8x128xf32>
    %97 = tpu.matmul %96, %93, %cst_60 {dimension_numbers = #tpu.dot_dimension_numbers<[1], [0], [0], [1], [0, 0, 1, 1], [], []>} : vector<8x128xbf16>, vector<128x128xbf16>, vector<8x128xf32> -> vector<8x128xf32>
    %98 = vector.broadcast %95 : vector<1x128xf32> to vector<8x128xf32>
    %99 = arith.addf %97, %98 : vector<8x128xf32>
    %100 = vector.extract_strided_slice %99 {offsets = [0, 0], sizes = [8, 4], strides = [1, 1]} : vector<8x128xf32> to vector<8x4xf32>
    %c0_61 = arith.constant 0 : index
    %c0_62 = arith.constant 0 : index
    %101 = vector.load %arg4[%c0_61, %c0_62] : memref<8x4xf32, #tpu.memory_space<vmem>>, vector<8x4xf32>
    tpu.vector_store %arg4[%c0_61, %c0_62], %100 {strides = array<i32>} : memref<8x4xf32, #tpu.memory_space<vmem>>, vector<8x4xf32>,
    return
  }
  func.func @transform_0(%arg0: i32) -> (i32, i32) {
    %c0_i32 = arith.constant 0 : i32
    %c0_i32_0 = arith.constant 0 : i32
    return %arg0, %c0_i32 : i32, i32
  }
  func.func @transform_1(%arg0: i32) -> (i32, i32, i32) {
    %c0_i32 = arith.constant 0 : i32
    %c0_i32_0 = arith.constant 0 : i32
    %c0_i32_1 = arith.constant 0 : i32
    %c0_i32_2 = arith.constant 0 : i32
    return %c0_i32, %c0_i32_0, %c0_i32_1 : i32, i32, i32
  }
  func.func @transform_2(%arg0: i32) -> (i32, i32, i32) {
    %c0_i32 = arith.constant 0 : i32
    %c0_i32_0 = arith.constant 0 : i32
    %c0_i32_1 = arith.constant 0 : i32
    %c0_i32_2 = arith.constant 0 : i32
    return %c0_i32, %c0_i32_0, %c0_i32_1 : i32, i32, i32
  }
  func.func @transform_3(%arg0: i32) -> (i32, i32) {
    %c0_i32 = arith.constant 0 : i32
    %c0_i32_0 = arith.constant 0 : i32
    return %arg0, %c0_i32 : i32, i32
  }
}

</mosaic_0001>

<bundles_post_ra>
// kernel: forward.1
= control target key start
LH: loop header
LB: loop body
LE: loop exit
PB: predicated region body
PF: predicated region fallthrough
CT: control target
= control target key end

     0   :  { %8 = vsyncpa [#allocation3], 0  ;;  %s1170_s12 = smov 0   ;;  %s1218_s0 = inlined_call_operand.vmem [shape: f32[16,8], index: 0, kind: input, shape index: {}]   ;;  %s1219_s1 = inlined_call_operand.hbm [shape: bf16[7,128,128], index: 1, kind: input, shape index: {}]   ;;  %s1220_s2 = inlined_call_operand.vmem [shape: f32[7,1,128], index: 2, kind: input, shape index: {}]   ;;  %s1221_s3 = inlined_call_operand.vmem [shape: f32[16,4], index: 3, kind: output, shape index: {}]  }
   0x1 LB: > { %s124_s15 = sshll.u32 %s1219_s1, 4  ;;  %s807_s16 = sadd.s32 4294967295, %s1145_s12   ;;  %s1145_s12 = sphi %s1170_s12, %s14_s12   ;;  %s125_s15 = int_to_ptr.hbm [resolvable:$true] %s124_s15 }
   0x2   : > { %p809_p0 = scmp.ge.s32.totalorder %s1145_s12, 1  ;;  %p113_p1 = scmp.lt.s32.totalorder %s1145_s12, 3 }
   0x3   : > { %p1073_p2 = scmp.eq.s32.totalorder %s807_s16, 0  ;;  %s1147_s17 = smov [#allocation2]  }
   0x4   : > { %p114_p3 = pnand %p809_p0, %p113_p1  ;;  %s126_s18 = sshll.u32 %s1147_s17, 4  ;;  %s127_s18 = int_to_ptr.vmem [resolvable:$true] %s126_s18 }
   0x5   : > { %s1148_s19 = smov 64   ;;  %s1149_s20 = smov 4  }
   0x6   : > { %p1069_p4 = pneg %p114_p3  ;;  %152 = sbr.rel (%p114_p3) target bundleno = 1030 (0x406), region = 32 }
   0x8   : > { %p1070_p5 = pnand %p1073_p2, %p1069_p4 }
   0xa   : > { %1072 = dma.hbm_to_vmem [thread:$0]  (!%p1070_p5), %s125_s15, 7168, %s127_s18, [#allocation3], %s1148_s19, %s1148_s19, %s1149_s20  }
   0xb   : > { %1140 = dma.done.wait (%p1073_p2), [#allocation3], 7168  }
   0xc   : > { %1142 = vsyncadd (%p1073_p2), [#allocation3], 4294960128  ;;  %p175_p6 = scmp.lt.s32.totalorder %s807_s16, 1  ;;  %vm195_vm0 = vcmask 1043456   ;;  %v185_v0 = vld [vmem:[#allocation2] sm:$0xf] }
   0xd   : > { %v1024_v2 = vld [vmem:[#allocation2 + $0x78] sm:$0xff]  ;;  %v197_v3 = vsel %vm195_vm0, %v185_v0, 0  ;;  %vm191_vm1 = vcmask 64512   ;;  %v1023_v5 = vld [vmem:[#allocation2 + $0x70] sm:$0xff]  ;;  %v1022_v6 = vld [vmem:[#allocation2 + $0x68] sm:$0xff]  ;;  %vm740_vm2 = vcmask 31744  }
   0xe   : > { %s1223_s16 = smov (!%p175_p6, %s807_s16), 1  ;;  %206 = vmatpush.bf16.msra.mxu0 %v197_v3  ;;  %287 = vmatpush.bf16.msra.mxu1 %v1024_v2  ;;  %v1021_v7 = vld [vmem:[#allocation2 + $0x60] sm:$0xff]  ;;  %v1020_v8 = vld [vmem:[#allocation2 + $0x58] sm:$0xff]  ;;  %v1019_v9 = vld [vmem:[#allocation2 + $0x50] sm:$0xff] }
   0xf   : > { %s814_s21 = sshll.u32 %s1223_s16, 3  ;;  %v1018_v10 = vld [vmem:[#allocation2 + $0x48] sm:$0xff]  ;;  %v1017_v11 = vld [vmem:[#allocation2 + $0x40] sm:$0xff]  ;;  %v1032_v12 = vld [vmem:[#allocation2 + $0xb8] sm:$0xff] }
  0x10   : > { %s178_s24 = scalar_lea.vmem %s1218_s0, %s814_s21  ;;  %375 = vmatpush.bf16.msra.mxu2 %v1032_v12  ;;  %v1031_v13 = vld [vmem:[#allocation2 + $0xb0] sm:$0xff]  ;;  %v1030_v14 = vld [vmem:[#allocation2 + $0xa8] sm:$0xff]  ;;  %v1029_v15 = vld [vmem:[#allocation2 + $0xa0] sm:$0xff]  ;;  %s182_s15 = scalar_lea.vmem %s1221_s3, %s814_s21 }
  0x11   : > { %v184_v1 = vld [vmem:[%s178_s24] sm:$0xff]  ;;  %v1028_v25 = vld [vmem:[#allocation2 + $0x98] sm:$0xff]  ;;  %v1027_v26 = vld [vmem:[#allocation2 + $0x90] sm:$0xff] }
  0x12   : > { %v187_v4 = vpack.c.bf16 %v184_v1, %v184_v1  ;;  %288 = vmatpush.bf16.msra.mxu1 %v1023_v5  ;;  %v1086_v16 = vld [vmem:[%s1220_s2] ss:$0 sm:$0xff]  ;;  %v1026_v27 = vld [vmem:[#allocation2 + $0x88] sm:$0xff]  ;;  %v1040_v29 = vld [vmem:[#allocation2 + $0xf8] sm:$0xff] }
  0x13   : > { %v1025_v28 = vld [vmem:[#allocation2 + $0x80] sm:$0xff]  ;;  %463 = vmatpush.bf16.msra.mxu3 %v1040_v29  ;;  %v1039_v30 = vld [vmem:[#allocation2 + $0xf0] sm:$0xff]  ;;  %v1038_v31 = vld [vmem:[#allocation2 + $0xe8] sm:$0xff] }
  0x14   : > { %816 = vmatmul.msk.bf16.vlgmr.msra.gmra.mxu0 %vm191_vm1, %v187_v4  ;;  %376 = vmatpush.bf16.msra.mxu2 %v1031_v13  ;;  %v1037_v32 = vld [vmem:[#allocation2 + $0xe0] sm:$0xff]  ;;  %v1036_v42 = vld [vmem:[#allocation2 + $0xd8] sm:$0xff]  ;;  %v1035_v43 = vld [vmem:[#allocation2 + $0xd0] sm:$0xff] }
  0x15   : > { %v1087_v33 = vld [vmem:[%s1220_s2 + $0x1] ss:$0 sm:$0xff]  ;;  %v1034_v44 = vld [vmem:[#allocation2 + $0xc8] sm:$0xff]  ;;  %v1048_v46 = vld [vmem:[#allocation2 + $0x138] sm:$0xff] }
  0x16   : > { %289 = vmatpush.bf16.msra.mxu1 %v1022_v6  ;;  %v1033_v45 = vld [vmem:[#allocation2 + $0xc0] sm:$0xff]  ;;  %551 = vmatpush.bf16.msrb.mxu0 %v1048_v46  ;;  %v1047_v47 = vld [vmem:[#allocation2 + $0x130] sm:$0xff]  ;;  %v1046_v48 = vld [vmem:[#allocation2 + $0x128] sm:$0xff] }
  0x17   : > { %464 = vmatpush.bf16.msra.mxu3 %v1039_v30  ;;  %v1045_v49 = vld [vmem:[#allocation2 + $0x120] sm:$0xff]  ;;  %v1044_v59 = vld [vmem:[#allocation2 + $0x118] sm:$0xff]  ;;  %v1043_v60 = vld [vmem:[#allocation2 + $0x110] sm:$0xff] }
  0x18   : > { %377 = vmatpush.bf16.msra.mxu2 %v1030_v14  ;;  %v1088_v50 = vld [vmem:[%s1220_s2 + $0x2] ss:$0 sm:$0xff]  ;;  %v1042_v61 = vld [vmem:[#allocation2 + $0x108] sm:$0xff]  ;;  %v1056_v63 = vld [vmem:[#allocation2 + $0x178] sm:$0xff] }
  0x19   : > { %v1041_v62 = vld [vmem:[#allocation2 + $0x100] sm:$0xff]  ;;  %v1055_v0 = vld [vmem:[#allocation2 + $0x170] sm:$0xff]  ;;  %v1054_v1 = vld [vmem:[#allocation2 + $0x168] sm:$0xff] }
  0x1a   : > { %290 = vmatpush.bf16.msra.mxu1 %v1021_v7  ;;  %552 = vmatpush.bf16.msrb.mxu0 %v1047_v47  ;;  %v1053_v2 = vld [vmem:[#allocation2 + $0x160] sm:$0xff]  ;;  %v1052_v12 = vld [vmem:[#allocation2 + $0x158] sm:$0xff]  ;;  %v1051_v13 = vld [vmem:[#allocation2 + $0x150] sm:$0xff] }
  0x1b   : > { %465 = vmatpush.bf16.msra.mxu3 %v1038_v31  ;;  %v1089_v3 = vld [vmem:[%s1220_s2 + $0x3] ss:$0 sm:$0xff]  ;;  %v1050_v14 = vld [vmem:[#allocation2 + $0x148] sm:$0xff]  ;;  %v1060_v29 = vld [vmem:[#allocation2 + $0x198] sm:$0xff] }
  0x1c   : > { %378 = vmatpush.bf16.msra.mxu2 %v1029_v15  ;;  %v1049_v15 = vld [vmem:[#allocation2 + $0x140] sm:$0xff]  ;;  %v1059_v30 = vld [vmem:[#allocation2 + $0x190] sm:$0xff]  ;;  %v1058_v31 = vld [vmem:[#allocation2 + $0x188] sm:$0xff] }
  0x1e   : > { %291 = vmatpush.bf16.msra.mxu1 %v1020_v8  ;;  %553 = vmatpush.bf16.msrb.mxu0 %v1046_v48 }
  0x1f   : > { %466 = vmatpush.bf16.msra.mxu3 %v1037_v32  ;;  %v1057_v32 = vld [vmem:[#allocation2 + $0x180] sm:$0xff] }
  0x20   : > { %379 = vmatpush.bf16.msra.mxu2 %v1028_v25 }
  0x22   : > { %292 = vmatpush.bf16.msra.mxu1 %v1019_v9  ;;  %554 = vmatpush.bf16.msrb.mxu0 %v1045_v49 }
  0x23   : > { %467 = vmatpush.bf16.msra.mxu3 %v1036_v42  ;;  %v1092_v42 = vld [vmem:[%s1220_s2 + $0x6] ss:$0 sm:$0xff] }
  0x24   : > { %380 = vmatpush.bf16.msra.mxu2 %v1027_v26 }
  0x26   : > { %293 = vmatpush.bf16.msra.mxu1 %v1018_v10  ;;  %555 = vmatpush.bf16.msrb.mxu0 %v1044_v59 }
  0x27   : > { %468 = vmatpush.bf16.msra.mxu3 %v1035_v43 }
  0x28   : > { %381 = vmatpush.bf16.msra.mxu2 %v1026_v27 }
  0x2a   : > { %294 = vmatpush.bf16.msra.mxu1 %v1017_v11  ;;  %556 = vmatpush.bf16.msrb.mxu0 %v1043_v60 }
  0x2b   : > { %469 = vmatpush.bf16.msra.mxu3 %v1034_v44 }
  0x2c   : > { %382 = vmatpush.bf16.msra.mxu2 %v1025_v28 }
  0x2e   : > { %557 = vmatpush.bf16.msrb.mxu0 %v1042_v61  ;;  %639 = vmatpush.bf16.msrb.mxu1 %v1056_v63 }
  0x2f   : > { %470 = vmatpush.bf16.msra.mxu3 %v1033_v45 }
  0x32   : > { %558 = vmatpush.bf16.msrb.mxu0 %v1041_v62  ;;  %640 = vmatpush.bf16.msrb.mxu1 %v1055_v0 }
  0x36   : > { %641 = vmatpush.bf16.msrb.mxu1 %v1054_v1 }
  0x3a   : > { %642 = vmatpush.bf16.msrb.mxu1 %v1053_v2 }
  0x3e   : > { %643 = vmatpush.bf16.msrb.mxu1 %v1052_v12 }
  0x42   : > { %644 = vmatpush.bf16.msrb.mxu1 %v1051_v13 }
  0x46   : > { %645 = vmatpush.bf16.msrb.mxu1 %v1050_v14 }
  0x4a   : > { %646 = vmatpush.bf16.msrb.mxu1 %v1049_v15 }
  0x91   : > { %v208_v17 = vpop.f32.mrf.mxu0 }
  0x92   : > { %v209_v18 = vadd.f32 %v1086_v16, %v208_v17  ;;  %v1064_v16 = vld [vmem:[#allocation2 + $0x1b8] sm:$0xff]  ;;  %v1063_v17 = vld [vmem:[#allocation2 + $0x1b0] sm:$0xff] }
  0x93   : > { %727 = vmatpush.bf16.msrb.mxu2 %v1064_v16 }
  0x94   : > { %v212_v19 = vmul.f32 0.5, %v209_v18  ;;  %v1062_v18 = vld [vmem:[#allocation2 + $0x1a8] sm:$0xff] }
  0x96   : > { %1093 = vtanh.f32 %v212_v19  ;;  %v1061_v19 = vld [vmem:[#allocation2 + $0x1a0] sm:$0xff] }
  0x97   : > { %728 = vmatpush.bf16.msrb.mxu2 %v1063_v17 }
  0x99   : > { %v210_v20 = vpop.f32.mrf.mxu0 }
  0x9a   : > { %v1090_v20 = vld [vmem:[%s1220_s2 + $0x4] ss:$0 sm:$0xff] }
  0x9b   : > { %729 = vmatpush.bf16.msrb.mxu2 %v1062_v18 }
  0x9c   : > { %v1094_v21 = vpop.eup %1093 }
  0x9d   : > { %v214_v22 = vadd.f32 1.0, %v1094_v21 }
  0x9f   : > { %v215_v23 = vmul.f32 0.5, %v214_v22  ;;  %730 = vmatpush.bf16.msrb.mxu2 %v1061_v19 }
  0xa1   : > { %v235_v24 = vpack.c.bf16 %v215_v23, %v215_v23 }
  0xa3   : > { %295 = vmatmul.bf16.vlgmr.msra.gmra.mxu1 %v235_v24  ;;  %731 = vmatpush.bf16.msrb.mxu2 %v1060_v29 }
  0xa7   : > { %732 = vmatpush.bf16.msrb.mxu2 %v1059_v30 }
  0xab   : > { %733 = vmatpush.bf16.msrb.mxu2 %v1058_v31 }
  0xaf   : > { %734 = vmatpush.bf16.msrb.mxu2 %v1057_v32 }
 0x120   : > { %v296_v34 = vpop.f32.mrf.mxu1 }
 0x121   : > { %v297_v35 = vadd.f32 %v1087_v33, %v296_v34  ;;  %v1091_v33 = vld [vmem:[%s1220_s2 + $0x5] ss:$0 sm:$0xff] }
 0x123   : > { %v300_v36 = vmul.f32 0.5, %v297_v35 }
 0x125   : > { %1095 = vtanh.f32 %v300_v36 }
 0x128   : > { %v298_v37 = vpop.f32.mrf.mxu1 }
 0x12b   : > { %v1096_v38 = vpop.eup %1095 }
 0x12c   : > { %v302_v39 = vadd.f32 1.0, %v1096_v38 }
 0x12e   : > { %v303_v40 = vmul.f32 0.5, %v302_v39 }
 0x130   : > { %v323_v41 = vpack.c.bf16 %v303_v40, %v303_v40 }
 0x132   : > { %383 = vmatmul.bf16.vlgmr.msra.gmra.mxu2 %v323_v41 }
 0x1b5   : > { %v384_v51 = vpop.f32.mrf.mxu2 }
 0x1b6   : > { %v385_v52 = vadd.f32 %v1088_v50, %v384_v51 }
 0x1b8   : > { %v388_v53 = vmul.f32 0.5, %v385_v52 }
 0x1ba   : > { %1097 = vtanh.f32 %v388_v53 }
 0x1bd   : > { %v386_v54 = vpop.f32.mrf.mxu2 }
 0x1c0   : > { %v1098_v55 = vpop.eup %1097 }
 0x1c1   : > { %v390_v56 = vadd.f32 1.0, %v1098_v55 }
 0x1c3   : > { %v391_v57 = vmul.f32 0.5, %v390_v56 }
 0x1c5   : > { %v411_v58 = vpack.c.bf16 %v391_v57, %v391_v57 }
 0x1c7   : > { %471 = vmatmul.bf16.vlgmr.msra.gmra.mxu3 %v411_v58 }
 0x24a   : > { %v472_v4 = vpop.f32.mrf.mxu3 }
 0x24b   : > { %v473_v5 = vadd.f32 %v1089_v3, %v472_v4 }
 0x24d   : > { %v476_v6 = vmul.f32 0.5, %v473_v5 }
 0x24f   : > { %1099 = vtanh.f32 %v476_v6 }
 0x252   : > { %v474_v7 = vpop.f32.mrf.mxu3 }
 0x255   : > { %v1100_v8 = vpop.eup %1099 }
 0x256   : > { %v478_v9 = vadd.f32 1.0, %v1100_v8 }
 0x258   : > { %v479_v10 = vmul.f32 0.5, %v478_v9 }
 0x25a   : > { %v499_v11 = vpack.c.bf16 %v479_v10, %v479_v10 }
 0x25c   : > { %559 = vmatmul.bf16.vlgmr.msrb.gmra.mxu0 %v499_v11 }
 0x2d9   : > { %v560_v21 = vpop.f32.mrf.mxu0 }
 0x2da   : > { %v561_v22 = vadd.f32 %v1090_v20, %v560_v21 }
 0x2dc   : > { %v564_v23 = vmul.f32 0.5, %v561_v22 }
 0x2de   : > { %1101 = vtanh.f32 %v564_v23 }
 0x2e1   : > { %v562_v24 = vpop.f32.mrf.mxu0 }
 0x2e4   : > { %v1102_v25 = vpop.eup %1101 }
 0x2e5   : > { %v566_v26 = vadd.f32 1.0, %v1102_v25 }
 0x2e7   : > { %v567_v27 = vmul.f32 0.5, %v566_v26 }
 0x2e9   : > { %v587_v28 = vpack.c.bf16 %v567_v27, %v567_v27 }
 0x2eb   : > { %647 = vmatmul.bf16.vlgmr.msrb.gmra.mxu1 %v587_v28 }
 0x368   : > { %v648_v34 = vpop.f32.mrf.mxu1 }
 0x369   : > { %v649_v35 = vadd.f32 %v1091_v33, %v648_v34 }
 0x36b   : > { %v652_v36 = vmul.f32 0.5, %v649_v35 }
 0x36d   : > { %1103 = vtanh.f32 %v652_v36 }
 0x370   : > { %v650_v37 = vpop.f32.mrf.mxu1 }
 0x373   : > { %v1104_v38 = vpop.eup %1103 }
 0x374   : > { %v654_v39 = vadd.f32 1.0, %v1104_v38 }
 0x376   : > { %v655_v40 = vmul.f32 0.5, %v654_v39 }
 0x378   : > { %v675_v41 = vpack.c.bf16 %v655_v40, %v655_v40 }
 0x37a   : > { %735 = vmatmul.bf16.vlgmr.msrb.gmra.mxu2 %v675_v41 }
 0x3fd   : > { %v736_v43 = vpop.f32.mrf.mxu2 }
 0x3fe   : > { %v737_v44 = vadd.f32 %v1092_v42, %v736_v43 }
 0x400   : > { %741 = vst.msk [vmem:[%s182_s15] sm:$0xff] %vm740_vm2, %v737_v44 }
 0x405   : > { %v738_v45 = vpop.f32.mrf.mxu2 }
 0x406 PF: > { %s14_s12 = sadd.s32 1, %s1145_s12  }
 0x407   : > { %p11_p7 = scmp.ge.s32.totalorder %s14_s12, 4  }
 0x409   :  { %13 = sbr.rel (!%p11_p7) target bundleno = 1 (0x1), region = 79 }
 0x40e   :  { %761 = vsyncpa [#allocation3], 1 }
 0x40f   :  { %763 = vsyncpa [#allocation3 + $0x1], 1 }

</bundles_post_ra>
